<compile_context>
chip_gen: v5e
topology: v5e:2x2
jax: 0.10.0
libtpu: 0.0.40
codegen_flags: <defaults>
</compile_context>

<pallas_src>
import math
import functools

import jax
import jax.numpy as jnp
from jax import lax
from jax.experimental import pallas as pl
from jax.experimental.pallas import tpu as pltpu


# ----------------------------------------------------------------------------
# Parameter setup (mirrors PositionalEncoding.__init__)
# ----------------------------------------------------------------------------
def make_pos_embedding(maxlen: int, emb_size: int, dtype=jnp.float32):
    pos = jnp.arange(0, maxlen, dtype=jnp.float32).reshape(maxlen, 1)
    denominator = jnp.exp(
        -jnp.arange(0, emb_size, 2, dtype=jnp.float32) * math.log(10000.0) / emb_size
    )
    pe = jnp.zeros((maxlen, emb_size), dtype=jnp.float32)
    pe = pe.at[:, 0::2].set(jnp.sin(pos * denominator))
    pe = pe.at[:, 1::2].set(jnp.cos(pos * denominator))
    return pe.astype(dtype)


# ----------------------------------------------------------------------------
# Counter-based hash PRNG (non-TPU / interpret-mode fallback only)
# ----------------------------------------------------------------------------
def _uniform_u32(idx_u32, seed_u32):
    x = idx_u32 + seed_u32 * jnp.uint32(0x9E3779B1)
    x = x ^ (x >> 16)
    x = x * jnp.uint32(0x85EBCA6B)
    x = x ^ (x >> 13)
    x = x * jnp.uint32(0xC2B2AE35)
    x = x ^ (x >> 16)
    return x


# ----------------------------------------------------------------------------
# Pallas kernel: one (ts, B, E) tile of out = dropout(x + pe)
# ----------------------------------------------------------------------------
def _pe_dropout_kernel(seed_ref, x_ref, pe_ref, o_ref, *,
                       dropout_p, apply_dropout, use_hw_prng):
    # x_ref : (ts, B, E)   token-embedding tile
    # pe_ref: (ts, 1, E)   matching positional rows (x's dtype)
    x = x_ref[...]
    y = x + pe_ref[...]                      # broadcast over batch axis: free

    if apply_dropout:
        blk = pl.program_id(0)
        if use_hw_prng:
            # Per-block independent, deterministic stream: seed mixes the user
            # seed and the grid block id on the scalar path (no vector index
            # math at all).
            pltpu.prng_seed(seed_ref[0], blk)
            bits = pltpu.prng_random_bits(y.shape)
            u = pltpu.bitcast(bits, jnp.uint32)
        else:
            # Fallback (interpret mode / non-TPU): block id folded into the
            # seed scalar; vector index is block-local -> loop-invariant iota
            # and no 32-bit overflow for large tensors.
            seed = (seed_ref[0].astype(jnp.uint32) * jnp.uint32(0x9E3779B1)
                    + blk.astype(jnp.uint32))
            shape = y.shape
            r = lax.broadcasted_iota(jnp.int32, shape, 0)
            b = lax.broadcasted_iota(jnp.int32, shape, 1)
            e = lax.broadcasted_iota(jnp.int32, shape, 2)
            idx = ((r * shape[1] + b) * shape[2] + e).astype(jnp.uint32)
            u = _uniform_u32(idx, seed)

        # keep element iff uniform >= p (inverted dropout, scale by 1/(1-p))
        thresh = jnp.uint32(min(int(dropout_p * float(2 ** 32)), 2 ** 32 - 1))
        keep = u >= thresh
        scale = jnp.asarray(1.0 / (1.0 - dropout_p), dtype=y.dtype)
        y = jnp.where(keep, y * scale, jnp.zeros_like(y))

    o_ref[...] = y.astype(o_ref.dtype)


# ----------------------------------------------------------------------------
# Wrapper: forward(token_embedding) = dropout(token_embedding + pe[:S])
# ----------------------------------------------------------------------------
def positional_encoding_forward(token_embedding, pos_embedding, *,
                                dropout_p=0.0, training=True, seed=0,
                                use_hw_prng=None,
                                target_block_bytes=6 * 1024 * 1024):
    S, B, E = token_embedding.shape
    dtype = token_embedding.dtype
    itemsize = jnp.dtype(dtype).itemsize

    if use_hw_prng is None:
        use_hw_prng = jax.default_backend() == "tpu"

    # Match x's dtype (bf16 inputs: halves pe DMA bytes) and add a unit batch
    # axis so the in-kernel add broadcasts over batch without a tile.
    pe3 = pos_embedding[:S].astype(dtype).reshape(S, 1, E)

    # ---- sequence-axis tiling ------------------------------------------
    sub = max(8, 32 // itemsize)          # sublane pack: 8 f32 / 16 bf16 / 32 i8
    row_bytes = B * E * itemsize
    ts = max(sub, (target_block_bytes // max(row_bytes, 1)) // sub * sub)
    # Prefer >= 4 grid steps when S allows: pipeline depth + both v7x cores.
    if S >= 4 * sub:
        ts = min(ts, max(sub, (S // 4) // sub * sub))
    ts = int(min(ts, S))
    n_blocks = int(pl.cdiv(S, ts))        # partial tail handled by Pallas

    # Explicit scoped-VMEM limit: double-buffered x, out and pe blocks + margin.
    # Kept well under v7x's 64 MiB physical VMEM; raises v5e's 16 MiB default.
    x_blk = ts * B * E * itemsize
    pe_blk = ts * E * itemsize
    footprint = 2 * (2 * x_blk + pe_blk)
    vmem_limit = int(min(max(footprint + (4 << 20), 16 << 20), 64 << 20))

    apply_dropout = bool(training) and float(dropout_p) > 0.0
    kernel = functools.partial(
        _pe_dropout_kernel, dropout_p=float(dropout_p),
        apply_dropout=apply_dropout, use_hw_prng=bool(use_hw_prng))

    grid_spec = pltpu.PrefetchScalarGridSpec(
        num_scalar_prefetch=1,                           # dropout seed -> SMEM
        grid=(n_blocks,),
        in_specs=[
            pl.BlockSpec((ts, B, E), lambda i, seed_r: (i, 0, 0)),
            pl.BlockSpec((ts, 1, E), lambda i, seed_r: (i, 0, 0)),
        ],
        out_specs=pl.BlockSpec((ts, B, E), lambda i, seed_r: (i, 0, 0)),
    )

    seed_arr = jnp.array([seed], dtype=jnp.int32)
    out = pl.pallas_call(
        kernel,
        out_shape=jax.ShapeDtypeStruct((S, B, E), dtype),
        grid_spec=grid_spec,
        # Elementwise, per-block-seeded PRNG, no carried state -> parallel.
        compiler_params=pltpu.CompilerParams(
            dimension_semantics=("parallel",),
            vmem_limit_bytes=vmem_limit),
    )(seed_arr, token_embedding, pe3)

    return out


# ----------------------------------------------------------------------------
# Demo / sanity check
# ----------------------------------------------------------------------------
if __name__ == "__main__":
    key = jax.random.PRNGKey(0)

    seq_len, batch, emb_size = 8, 2, 32
    maxlen = 64
    dropout_p = 0.1

    x = jax.random.normal(key, (seq_len, batch, emb_size), dtype=jnp.float32)
    pos_embedding = make_pos_embedding(maxlen, emb_size)
    ref = x + pos_embedding[:seq_len][:, None, :]

    # Eval path (dropout disabled) — must match the pure-JAX reference.
    out_eval = positional_encoding_forward(
        x, pos_embedding, dropout_p=dropout_p, training=False
    )
    out_eval = jax.block_until_ready(out_eval)
    assert out_eval.shape == x.shape
    assert jnp.allclose(out_eval, ref, atol=1e-6), "eval mismatch vs. reference"

    # Training path with in-kernel dropout: every element must be either
    # dropped (0) or the reference value scaled by 1/(1-p).
    out_train = positional_encoding_forward(
        x, pos_embedding, dropout_p=dropout_p, training=True, seed=1234
    )
    out_train = jax.block_until_ready(out_train)
    assert out_train.shape == x.shape
    kept_val = ref / (1.0 - dropout_p)
    ok = jnp.isclose(out_train, 0.0, atol=1e-6) | jnp.isclose(
        out_train, kept_val, atol=1e-5)
    assert bool(jnp.all(ok)), "dropout output not in {0, ref/(1-p)}"

    print("KERNEL_OK")
</pallas_src>

<mosaic_0001>
module attributes {stable_mosaic.version = 11 : i64} {
  func.func @_pe_dropout_kernel(%arg0: i32, %arg1: memref<1xi32, #tpu.memory_space<smem>>, %arg2: memref<8x2x32xf32, #tpu.memory_space<vmem>>, %arg3: memref<8x1x32xf32, #tpu.memory_space<vmem>>, %arg4: memref<8x2x32xf32, #tpu.memory_space<vmem>>) attributes {dimension_semantics = [#tpu.dimension_semantics<parallel>], iteration_bounds = array<i64: 1>, scalar_prefetch = 1 : i64, scratch_operands = 0 : i64, tpu.core_type = #tpu.core_type<tc>, window_params = [{transform_indices = @transform_0, window_bounds = array<i64: 8, 2, 32>}, {transform_indices = @transform_1, window_bounds = array<i64: 8, 1, 32>}, {transform_indices = @transform_2, window_bounds = array<i64: 8, 2, 32>}]} {
    %c0 = arith.constant 0 : index
    %c0_0 = arith.constant 0 : index
    %c0_1 = arith.constant 0 : index
    %0 = vector.load %arg2[%c0, %c0_0, %c0_1] : memref<8x2x32xf32, #tpu.memory_space<vmem>>, vector<8x2x32xf32>
    %c0_2 = arith.constant 0 : index
    %c0_3 = arith.constant 0 : index
    %c0_4 = arith.constant 0 : index
    %1 = vector.load %arg3[%c0_2, %c0_3, %c0_4] : memref<8x1x32xf32, #tpu.memory_space<vmem>>, vector<8x1x32xf32>
    %2 = vector.broadcast %1 : vector<8x1x32xf32> to vector<8x2x32xf32>
    %3 = arith.addf %0, %2 : vector<8x2x32xf32>
    %c0_5 = arith.constant 0 : index
    %c0_6 = arith.constant 0 : index
    %c0_7 = arith.constant 0 : index
    %4 = vector.load %arg4[%c0_5, %c0_6, %c0_7] : memref<8x2x32xf32, #tpu.memory_space<vmem>>, vector<8x2x32xf32>
    tpu.vector_store %arg4[%c0_5, %c0_6, %c0_7], %3 {strides = array<i32>} : memref<8x2x32xf32, #tpu.memory_space<vmem>>, vector<8x2x32xf32>,
    return
  }
  func.func @transform_0(%arg0: i32, %arg1: memref<1xi32, #tpu.memory_space<smem>>) -> (i32, i32, i32) {
    %c0_i32 = arith.constant 0 : i32
    %c0_i32_0 = arith.constant 0 : i32
    %c0_i32_1 = arith.constant 0 : i32
    return %arg0, %c0_i32, %c0_i32_0 : i32, i32, i32
  }
  func.func @transform_1(%arg0: i32, %arg1: memref<1xi32, #tpu.memory_space<smem>>) -> (i32, i32, i32) {
    %c0_i32 = arith.constant 0 : i32
    %c0_i32_0 = arith.constant 0 : i32
    %c0_i32_1 = arith.constant 0 : i32
    return %arg0, %c0_i32, %c0_i32_0 : i32, i32, i32
  }
  func.func @transform_2(%arg0: i32, %arg1: memref<1xi32, #tpu.memory_space<smem>>) -> (i32, i32, i32) {
    %c0_i32 = arith.constant 0 : i32
    %c0_i32_0 = arith.constant 0 : i32
    %c0_i32_1 = arith.constant 0 : i32
    return %arg0, %c0_i32, %c0_i32_0 : i32, i32, i32
  }
}

</mosaic_0001>

<bundles_post_ra>
// kernel: tpu_custom_call.1
= control target key start
LH: loop header
LB: loop body
LE: loop exit
PB: predicated region body
PF: predicated region fallthrough
CT: control target
= control target key end

     0   :  { %9 = vsyncpa [#allocation5], 0  ;;  %s273_s0 = inlined_call_operand.<no memory space> [shape: s32[1], index: 0, kind: input, shape index: {}]   ;;  %s274_s1 = inlined_call_operand.hbm [shape: f32[8,2,32], index: 1, kind: input, shape index: {}]   ;;  %s275_s2 = inlined_call_operand.hbm [shape: f32[8,1,32], index: 2, kind: input, shape index: {}]   ;;  %s276_s3 = inlined_call_operand.hbm [shape: f32[8,2,32], index: 3, kind: output, shape index: {}]  }
   0x1   :  { %10 = vsyncpa [#allocation8], 0 }
   0x2   :  { %11 = vsyncpa [#allocation6], 0  ;;  %s16_s14 = sshll.u32 %s274_s1, 4  ;;  %s216_s15 = smov [#allocation4]   ;;  %s17_s14 = int_to_ptr.hbm [resolvable:$true] %s16_s14 }
   0x3   :  { %s18_s16 = sshll.u32 %s216_s15, 4  ;;  %s29_s18 = sshll.u32 %s275_s2, 4  ;;  %s19_s16 = int_to_ptr.vmem [resolvable:$true] %s18_s16  ;;  %s30_s18 = int_to_ptr.hbm [resolvable:$true] %s29_s18 }
   0x4   :  { %s217_s19 = smov 32   ;;  %s218_s20 = smov 2  }
   0x5   :  { %24 = dma.hbm_to_vmem [thread:$0]  %s17_s14, 256, %s19_s16, [#allocation5], %s217_s19, %s217_s19, %s218_s20  }
   0x6   :  { %s219_s21 = smov [#allocation7]   ;;  %s220_s23 = smov 16  }
   0x7   :  { %s31_s22 = sshll.u32 %s219_s21, 4  ;;  %s221_s1 = smov 1   ;;  %s32_s22 = int_to_ptr.vmem [resolvable:$true] %s31_s22 }
   0x8   :  { %37 = dma.hbm_to_vmem [thread:$0]  %s30_s18, 128, %s32_s22, [#allocation8], %s220_s23, %s220_s23, %s221_s1  }
   0x9   :  { %210 = dma.done.wait [#allocation5], 256  }
   0xa   :  { %211 = vsyncadd [#allocation5], 4294967040 }
   0xb   :  { %212 = dma.done.wait [#allocation8], 128  }
   0xc   :  { %213 = vsyncadd [#allocation8], 4294967168  ;;  %vm94_vm0 = vcmask 254976   ;;  %s222_s24 = smov [#allocation9]   ;;  %s109_s27 = sshll.u32 %s276_s3, 4  ;;  %s110_s27 = int_to_ptr.hbm [resolvable:$true] %s109_s27 }
   0xd   :  { %s252_s2 = sshll.u32 %s222_s24, 4  ;;  %v46_v0 = vld [vmem:[#allocation4] sm:$0x3]  ;;  %v130_v1 = vld [vmem:[#allocation7] ss:$0 sm:$0xff]  ;;  %s108_s2 = int_to_ptr.vmem [resolvable:$true] %s252_s2 }
   0xe   :  { %v47_v2 = vld [vmem:[#allocation4 + $0x2] sm:$0x3]  ;;  %v131_v3 = vld [vmem:[#allocation7 + $0x1] ss:$0 sm:$0xff]  ;;  %v86_v4 = vadd.f32 %v130_v1, %v46_v0  ;;  %v48_v5 = vld [vmem:[#allocation4 + $0x4] sm:$0x3] }
   0xf   :  { %v132_v6 = vld [vmem:[#allocation7 + $0x2] ss:$0 sm:$0xff]  ;;  %v87_v7 = vadd.f32 %v131_v3, %v47_v2  ;;  %v49_v8 = vld [vmem:[#allocation4 + $0x6] sm:$0x3]  ;;  %v133_v9 = vld [vmem:[#allocation7 + $0x3] ss:$0 sm:$0xff] }
  0x10   :  { %95 = vst.msk [vmem:[#allocation9] sm:$0x3] %vm94_vm0, %v86_v4  ;;  %v88_v10 = vadd.f32 %v132_v6, %v48_v5  ;;  %v50_v11 = vld [vmem:[#allocation4 + $0x8] sm:$0x3]  ;;  %v89_v12 = vadd.f32 %v133_v9, %v49_v8  ;;  %v134_v13 = vld [vmem:[#allocation7 + $0x4] ss:$0 sm:$0xff] }
  0x11   :  { %96 = vst.msk [vmem:[#allocation9 + $0x2] sm:$0x3] %vm94_vm0, %v87_v7  ;;  %v51_v14 = vld [vmem:[#allocation4 + $0xa] sm:$0x3]  ;;  %v135_v15 = vld [vmem:[#allocation7 + $0x5] ss:$0 sm:$0xff]  ;;  %v90_v16 = vadd.f32 %v134_v13, %v50_v11 }
  0x12   :  { %97 = vst.msk [vmem:[#allocation9 + $0x4] sm:$0x3] %vm94_vm0, %v88_v10  ;;  %v52_v17 = vld [vmem:[#allocation4 + $0xc] sm:$0x3]  ;;  %v91_v18 = vadd.f32 %v135_v15, %v51_v14  ;;  %v136_v19 = vld [vmem:[#allocation7 + $0x6] ss:$0 sm:$0xff] }
  0x13   :  { %98 = vst.msk [vmem:[#allocation9 + $0x6] sm:$0x3] %vm94_vm0, %v89_v12  ;;  %v53_v20 = vld [vmem:[#allocation4 + $0xe] sm:$0x3]  ;;  %v137_v21 = vld [vmem:[#allocation7 + $0x7] ss:$0 sm:$0xff]  ;;  %v92_v22 = vadd.f32 %v136_v19, %v52_v17 }
  0x14   :  { %99 = vst.msk [vmem:[#allocation9 + $0x8] sm:$0x3] %vm94_vm0, %v90_v16  ;;  %v93_v23 = vadd.f32 %v137_v21, %v53_v20 }
  0x15   :  { %100 = vst.msk [vmem:[#allocation9 + $0xa] sm:$0x3] %vm94_vm0, %v91_v18 }
  0x16   :  { %101 = vst.msk [vmem:[#allocation9 + $0xc] sm:$0x3] %vm94_vm0, %v92_v22 }
  0x17   :  { %102 = vst.msk [vmem:[#allocation9 + $0xe] sm:$0x3] %vm94_vm0, %v93_v23 }
  0x18   :  { %115 = dma.vmem_to_hbm [thread:$0]  %s108_s2, 256, %s110_s27, [#allocation6], %s217_s19, %s217_s19, %s218_s20  }
  0x19   :  { %214 = dma.done.wait [#allocation6], 256  }
  0x1a   :  { %215 = vsyncadd [#allocation6], 4294967040 }
  0x1b   :  { %120 = vsyncpa [#allocation5], 1 }
  0x1c   :  { %121 = vsyncpa [#allocation8], 1 }
  0x1d   :  { %122 = vsyncpa [#allocation6], 1 }

</bundles_post_ra>
